<compile_context>
chip_gen: v5e
topology: v5e:2x2
jax: 0.10.0
libtpu: 0.0.40
codegen_flags: <defaults>
</compile_context>

<pallas_src>
import functools
import math

import numpy as np
import jax
import jax.numpy as jnp
from jax.experimental import pallas as pl
from jax.experimental.pallas import tpu as pltpu


def _filter_weights(kernel_size, std, mode):
    """1-D window weights (normalized). 'gaussian' or box average."""
    if mode == "gaussian":
        c = (kernel_size - 1) / 2.0
        ws = [math.exp(-((i - c) ** 2) / (2.0 * std * std)) for i in range(kernel_size)]
    else:
        ws = [1.0] * kernel_size
    s = sum(ws)
    return tuple(w / s for w in ws)


def _reflect_blur_matrix(n, weights):
    """(n, n) matrix M with (M @ v)[i] == sum_t w[t] * v[reflect(i + t - p)].

    Reflection convention matches jnp.pad / torch ReflectionPad2d (no edge repeat).
    """
    k = len(weights)
    p = k // 2
    m = np.zeros((n, n), dtype=np.float32)
    for i in range(n):
        for t in range(k):
            j = i + t - p
            if j < 0:
                j = -j
            elif j >= n:
                j = 2 * n - 2 - j
            m[i, j] += weights[t]
    return m


def _photometric_kernel(ah_ref, bw_ref, x_ref, y_ref, m_ref, out_ref, *, alpha):
    """One (image, channel) step of the photometric loss.

    ah_ref : (H, H)  H-pass blur matrix (reflection folded in)
    bw_ref : (W, W)  W-pass blur matrix (reflection folded in, already transposed)
    x_ref  : (1, 1, H, W)  pred  channel (orig dtype)
    y_ref  : (1, 1, H, W)  target channel (orig dtype)
    m_ref  : (1, 1, H, W)  valid mask (f32), constant over the channel axis
    out_ref: (1, 2, 128)   row 0: sum(loss*mask) accumulated over channels,
                           row 1: sum(mask)      (written once at c == 0)
    """
    c_idx = pl.program_id(1)

    x = x_ref[...][0, 0].astype(jnp.float32)   # (H, W)
    y = y_ref[...][0, 0].astype(jnp.float32)   # (H, W)
    m = m_ref[...][0, 0].astype(jnp.float32)   # (H, W)
    ah = ah_ref[...]                           # (H, H)
    bw = bw_ref[...]                           # (W, W)

    # Mask before SSIM (as in the PyTorch module).
    xm = x * m
    ym = y * m

    def blur(p):
        # Separable 7x7 Gaussian window with reflection padding, as two MXU matmuls.
        v = jnp.dot(p, bw, preferred_element_type=jnp.float32)    # W pass
        return jnp.dot(ah, v, preferred_element_type=jnp.float32)  # H pass

    mu_x = blur(xm)
    mu_y = blur(ym)
    sig_x = blur(xm * xm) - mu_x * mu_x
    sig_y = blur(ym * ym) - mu_y * mu_y
    sig_xy = blur(xm * ym) - mu_x * mu_y

    c1 = jnp.float32(0.01 ** 2)
    c2 = jnp.float32(0.03 ** 2)
    ssim_n = (2.0 * mu_x * mu_y + c1) * (2.0 * sig_xy + c2)
    ssim_d = (mu_x * mu_x + mu_y * mu_y + c1) * (sig_x + sig_y + c2)
    ssim = ssim_n * pl.reciprocal(ssim_d, approx=False)            # divide on EUP
    sim = (1.0 - ssim) * 0.5                                       # DSSIM

    l1 = jnp.abs(xm - ym)
    contrib = jnp.sum((sim * alpha + l1 * (1.0 - alpha)) * m)      # scalar

    row = jax.lax.broadcasted_iota(jnp.int32, out_ref.shape, 1)
    is_loss_row = row == 0

    @pl.when(c_idx == 0)
    def _init():
        # Row 0 <- 0 (loss accumulator), row 1 <- sum(mask) (count, per image).
        out_ref[...] = jnp.where(is_loss_row, 0.0, jnp.sum(m))

    out_ref[...] = out_ref[...] + jnp.where(is_loss_row, contrib, 0.0)


def photometric_pallas(pred, target, mask, *, alpha=0.85, kernel_size=7, std=1.5,
                       mode="gaussian"):
    """Batch-mean photometric loss; pred/target (B,C,H,W), mask (B,1,H,W)."""
    assert 0.0 <= alpha <= 1.0
    b, c, h, w = pred.shape
    g = _filter_weights(kernel_size, std, mode)

    ah = jnp.asarray(_reflect_blur_matrix(h, g))       # (H, H) left-multiply
    bw = jnp.asarray(_reflect_blur_matrix(w, g).T)     # (W, W) right-multiply
    mask = mask.astype(jnp.float32)

    kernel = functools.partial(_photometric_kernel, alpha=float(alpha))

    itemsize = jnp.dtype(pred.dtype).itemsize
    cost = pl.CostEstimate(
        flops=int(b * c * (10 * h * w * (h + w) + 40 * h * w)),
        transcendentals=int(b * c * h * w),
        bytes_accessed=int(b * c * h * w * 2 * itemsize + b * h * w * 4
                           + (h * h + w * w) * 4 + b * 2 * 128 * 4),
    )

    out = pl.pallas_call(
        kernel,
        out_shape=jax.ShapeDtypeStruct((b, 2, 128), jnp.float32),
        grid=(b, c),
        in_specs=[
            pl.BlockSpec((h, h), lambda bi, ci: (0, 0)),
            pl.BlockSpec((w, w), lambda bi, ci: (0, 0)),
            pl.BlockSpec((1, 1, h, w), lambda bi, ci: (bi, ci, 0, 0)),
            pl.BlockSpec((1, 1, h, w), lambda bi, ci: (bi, ci, 0, 0)),
            pl.BlockSpec((1, 1, h, w), lambda bi, ci: (bi, 0, 0, 0)),
        ],
        out_specs=pl.BlockSpec((1, 2, 128), lambda bi, ci: (bi, 0, 0)),
        compiler_params=pltpu.CompilerParams(
            dimension_semantics=("parallel", "arbitrary"),
            vmem_limit_bytes=48 * 1024 * 1024,
        ),
        cost_estimate=cost,
    )(ah, bw, pred, target, mask)

    loss_sum = out[:, 0, 0]
    cnt = out[:, 1, 0]
    return jnp.mean(loss_sum / cnt)        # inf/nan if cnt == 0 (guarded by caller)


def photometric_module(_output, _input, branch="tar_rgb", target="tar_rgb",
                       valid="src_valid", alpha=0.85, kernel_size=7, std=1.5,
                       mode="gaussian"):
    """Dict-based wrapper mirroring Photometric.forward semantics."""
    if branch not in _output or target not in _input:
        return jnp.asarray(0.0, dtype=jnp.float32)

    pred = _output[branch]
    tgt = _input[target]
    b, _, h, w = tgt.shape

    ones = jnp.ones((b, 1, h, w), dtype=jnp.float32)
    mask_in = _input[valid].astype(jnp.float32) if valid in _input else ones
    mask_out = _output[valid].astype(jnp.float32) if valid in _output else ones
    mask = mask_in * mask_out

    loss = photometric_pallas(pred, tgt, mask, alpha=alpha,
                              kernel_size=kernel_size, std=std, mode=mode)
    return jnp.where(jnp.isfinite(loss), loss, jnp.float32(0.0))


def _photometric_reference(pred, target, valid_mask, alpha=0.85, kernel_size=7, std=1.5):
    """Pure-JAX reference with identical math (for correctness check)."""
    b, c, h, w = pred.shape
    p = kernel_size // 2
    g = _filter_weights(kernel_size, std, "gaussian")

    mask = valid_mask.astype(jnp.float32)
    x = pred.astype(jnp.float32) * mask
    y = target.astype(jnp.float32) * mask
    xp = jnp.pad(x, ((0, 0), (0, 0), (p, p), (p, p)), mode="reflect")
    yp = jnp.pad(y, ((0, 0), (0, 0), (p, p), (p, p)), mode="reflect")

    def blur(a):
        v = sum(g[t] * a[:, :, t:t + h, :] for t in range(kernel_size))
        return sum(g[t] * v[:, :, :, t:t + w] for t in range(kernel_size))

    mu_x, mu_y = blur(xp), blur(yp)
    sx = blur(xp * xp) - mu_x * mu_x
    sy = blur(yp * yp) - mu_y * mu_y
    sxy = blur(xp * yp) - mu_x * mu_y
    c1, c2 = 0.01 ** 2, 0.03 ** 2
    ssim = ((2 * mu_x * mu_y + c1) * (2 * sxy + c2)) / \
           ((mu_x * mu_x + mu_y * mu_y + c1) * (sx + sy + c2))
    sim = (1.0 - ssim) * 0.5
    l1 = jnp.abs(x - y)
    lm = (sim * alpha + l1 * (1.0 - alpha)) * mask
    cnt = jnp.sum(mask, axis=(1, 2, 3))
    ls = jnp.sum(lm, axis=(1, 2, 3))
    loss = jnp.mean(ls / cnt)
    return jnp.where(jnp.isfinite(loss), loss, jnp.float32(0.0))


if __name__ == "__main__":
    key = jax.random.PRNGKey(0)
    k_pred, k_tgt, k_mask = jax.random.split(key, 3)

    B, C, H, W = 2, 3, 16, 16
    pred = jax.random.uniform(k_pred, (B, C, H, W), dtype=jnp.float32)
    target = jax.random.uniform(k_tgt, (B, C, H, W), dtype=jnp.float32)
    valid = jax.random.uniform(k_mask, (B, 1, H, W), dtype=jnp.float32) > 0.1

    _output = {"tar_rgb": pred}
    _input = {"tar_rgb": target, "src_valid": valid}

    result = photometric_module(_output, _input)
    result = jax.block_until_ready(result)

    ref = _photometric_reference(pred, target, valid)
    # Tolerance allows for the MXU f32 multi-pass blur vs. the VPU-summed reference.
    assert jnp.allclose(result, ref, rtol=2e-3, atol=1e-5), (result, ref)

    print("KERNEL_OK")
</pallas_src>

<mosaic_0001>
module attributes {stable_mosaic.version = 11 : i64} {
  func.func @_photometric_kernel(%arg0: i32, %arg1: i32, %arg2: memref<16x16xf32, #tpu.memory_space<vmem>>, %arg3: memref<16x16xf32, #tpu.memory_space<vmem>>, %arg4: memref<1x1x16x16xf32, #tpu.memory_space<vmem>>, %arg5: memref<1x1x16x16xf32, #tpu.memory_space<vmem>>, %arg6: memref<1x1x16x16xf32, #tpu.memory_space<vmem>>, %arg7: memref<1x2x128xf32, #tpu.memory_space<vmem>>) attributes {dimension_semantics = [#tpu.dimension_semantics<parallel>, #tpu.dimension_semantics<arbitrary>], iteration_bounds = array<i64: 2, 3>, scalar_prefetch = 0 : i64, scratch_operands = 0 : i64, tpu.core_type = #tpu.core_type<tc>, window_params = [{pipeline_mode = #tpu.pipeline_mode<synchronous>, transform_indices = @transform_0, window_bounds = array<i64: 16, 16>}, {pipeline_mode = #tpu.pipeline_mode<synchronous>, transform_indices = @transform_1, window_bounds = array<i64: 16, 16>}, {transform_indices = @transform_2, window_bounds = array<i64: 1, 1, 16, 16>}, {transform_indices = @transform_3, window_bounds = array<i64: 1, 1, 16, 16>}, {transform_indices = @transform_4, window_bounds = array<i64: 1, 1, 16, 16>}, {transform_indices = @transform_5, window_bounds = array<i64: 1, 2, 128>}]} {
    %c0 = arith.constant 0 : index
    %c0_0 = arith.constant 0 : index
    %c0_1 = arith.constant 0 : index
    %c0_2 = arith.constant 0 : index
    %0 = vector.load %arg4[%c0, %c0_0, %c0_1, %c0_2] : memref<1x1x16x16xf32, #tpu.memory_space<vmem>>, vector<1x1x16x16xf32>
    %1 = vector.shape_cast %0 : vector<1x1x16x16xf32> to vector<16x16xf32>
    %c0_3 = arith.constant 0 : index
    %c0_4 = arith.constant 0 : index
    %c0_5 = arith.constant 0 : index
    %c0_6 = arith.constant 0 : index
    %2 = vector.load %arg5[%c0_3, %c0_4, %c0_5, %c0_6] : memref<1x1x16x16xf32, #tpu.memory_space<vmem>>, vector<1x1x16x16xf32>
    %3 = vector.shape_cast %2 : vector<1x1x16x16xf32> to vector<16x16xf32>
    %c0_7 = arith.constant 0 : index
    %c0_8 = arith.constant 0 : index
    %c0_9 = arith.constant 0 : index
    %c0_10 = arith.constant 0 : index
    %4 = vector.load %arg6[%c0_7, %c0_8, %c0_9, %c0_10] : memref<1x1x16x16xf32, #tpu.memory_space<vmem>>, vector<1x1x16x16xf32>
    %5 = vector.shape_cast %4 : vector<1x1x16x16xf32> to vector<16x16xf32>
    %c0_11 = arith.constant 0 : index
    %c0_12 = arith.constant 0 : index
    %6 = vector.load %arg2[%c0_11, %c0_12] : memref<16x16xf32, #tpu.memory_space<vmem>>, vector<16x16xf32>
    %c0_13 = arith.constant 0 : index
    %c0_14 = arith.constant 0 : index
    %7 = vector.load %arg3[%c0_13, %c0_14] : memref<16x16xf32, #tpu.memory_space<vmem>>, vector<16x16xf32>
    %8 = arith.mulf %1, %5 : vector<16x16xf32>
    %9 = arith.mulf %3, %5 : vector<16x16xf32>
    %cst = arith.constant dense<0.000000e+00> : vector<16x16xf32>
    %10 = tpu.matmul %8, %7, %cst {dimension_numbers = #tpu.dot_dimension_numbers<[1], [0], [0], [1], [0, 0, 1, 1], [], []>} : vector<16x16xf32>, vector<16x16xf32>, vector<16x16xf32> -> vector<16x16xf32>
    %cst_15 = arith.constant dense<0.000000e+00> : vector<16x16xf32>
    %11 = tpu.matmul %6, %10, %cst_15 {dimension_numbers = #tpu.dot_dimension_numbers<[1], [0], [0], [1], [0, 0, 1, 1], [], []>} : vector<16x16xf32>, vector<16x16xf32>, vector<16x16xf32> -> vector<16x16xf32>
    %cst_16 = arith.constant dense<0.000000e+00> : vector<16x16xf32>
    %12 = tpu.matmul %9, %7, %cst_16 {dimension_numbers = #tpu.dot_dimension_numbers<[1], [0], [0], [1], [0, 0, 1, 1], [], []>} : vector<16x16xf32>, vector<16x16xf32>, vector<16x16xf32> -> vector<16x16xf32>
    %cst_17 = arith.constant dense<0.000000e+00> : vector<16x16xf32>
    %13 = tpu.matmul %6, %12, %cst_17 {dimension_numbers = #tpu.dot_dimension_numbers<[1], [0], [0], [1], [0, 0, 1, 1], [], []>} : vector<16x16xf32>, vector<16x16xf32>, vector<16x16xf32> -> vector<16x16xf32>
    %14 = arith.mulf %8, %8 : vector<16x16xf32>
    %cst_18 = arith.constant dense<0.000000e+00> : vector<16x16xf32>
    %15 = tpu.matmul %14, %7, %cst_18 {dimension_numbers = #tpu.dot_dimension_numbers<[1], [0], [0], [1], [0, 0, 1, 1], [], []>} : vector<16x16xf32>, vector<16x16xf32>, vector<16x16xf32> -> vector<16x16xf32>
    %cst_19 = arith.constant dense<0.000000e+00> : vector<16x16xf32>
    %16 = tpu.matmul %6, %15, %cst_19 {dimension_numbers = #tpu.dot_dimension_numbers<[1], [0], [0], [1], [0, 0, 1, 1], [], []>} : vector<16x16xf32>, vector<16x16xf32>, vector<16x16xf32> -> vector<16x16xf32>
    %17 = arith.mulf %11, %11 : vector<16x16xf32>
    %18 = arith.subf %16, %17 : vector<16x16xf32>
    %19 = arith.mulf %9, %9 : vector<16x16xf32>
    %cst_20 = arith.constant dense<0.000000e+00> : vector<16x16xf32>
    %20 = tpu.matmul %19, %7, %cst_20 {dimension_numbers = #tpu.dot_dimension_numbers<[1], [0], [0], [1], [0, 0, 1, 1], [], []>} : vector<16x16xf32>, vector<16x16xf32>, vector<16x16xf32> -> vector<16x16xf32>
    %cst_21 = arith.constant dense<0.000000e+00> : vector<16x16xf32>
    %21 = tpu.matmul %6, %20, %cst_21 {dimension_numbers = #tpu.dot_dimension_numbers<[1], [0], [0], [1], [0, 0, 1, 1], [], []>} : vector<16x16xf32>, vector<16x16xf32>, vector<16x16xf32> -> vector<16x16xf32>
    %22 = arith.mulf %13, %13 : vector<16x16xf32>
    %23 = arith.subf %21, %22 : vector<16x16xf32>
    %24 = arith.mulf %8, %9 : vector<16x16xf32>
    %cst_22 = arith.constant dense<0.000000e+00> : vector<16x16xf32>
    %25 = tpu.matmul %24, %7, %cst_22 {dimension_numbers = #tpu.dot_dimension_numbers<[1], [0], [0], [1], [0, 0, 1, 1], [], []>} : vector<16x16xf32>, vector<16x16xf32>, vector<16x16xf32> -> vector<16x16xf32>
    %cst_23 = arith.constant dense<0.000000e+00> : vector<16x16xf32>
    %26 = tpu.matmul %6, %25, %cst_23 {dimension_numbers = #tpu.dot_dimension_numbers<[1], [0], [0], [1], [0, 0, 1, 1], [], []>} : vector<16x16xf32>, vector<16x16xf32>, vector<16x16xf32> -> vector<16x16xf32>
    %27 = arith.mulf %11, %13 : vector<16x16xf32>
    %28 = arith.subf %26, %27 : vector<16x16xf32>
    %cst_24 = arith.constant 2.000000e+00 : f32
    %29 = vector.broadcast %cst_24 : f32 to vector<16x16xf32>
    %30 = arith.mulf %29, %11 : vector<16x16xf32>
    %31 = arith.mulf %30, %13 : vector<16x16xf32>
    %cst_25 = arith.constant 9.99999974E-5 : f32
    %32 = vector.broadcast %cst_25 : f32 to vector<16x16xf32>
    %33 = arith.addf %31, %32 : vector<16x16xf32>
    %cst_26 = arith.constant 2.000000e+00 : f32
    %34 = vector.broadcast %cst_26 : f32 to vector<16x16xf32>
    %35 = arith.mulf %34, %28 : vector<16x16xf32>
    %cst_27 = arith.constant 8.99999984E-4 : f32
    %36 = vector.broadcast %cst_27 : f32 to vector<16x16xf32>
    %37 = arith.addf %35, %36 : vector<16x16xf32>
    %38 = arith.mulf %33, %37 : vector<16x16xf32>
    %39 = arith.mulf %11, %11 : vector<16x16xf32>
    %40 = arith.mulf %13, %13 : vector<16x16xf32>
    %41 = arith.addf %39, %40 : vector<16x16xf32>
    %cst_28 = arith.constant 9.99999974E-5 : f32
    %42 = vector.broadcast %cst_28 : f32 to vector<16x16xf32>
    %43 = arith.addf %41, %42 : vector<16x16xf32>
    %44 = arith.addf %18, %23 : vector<16x16xf32>
    %cst_29 = arith.constant 8.99999984E-4 : f32
    %45 = vector.broadcast %cst_29 : f32 to vector<16x16xf32>
    %46 = arith.addf %44, %45 : vector<16x16xf32>
    %47 = arith.mulf %43, %46 : vector<16x16xf32>
    %48 = tpu.reciprocal %47 : vector<16x16xf32> -> vector<16x16xf32>
    %49 = arith.mulf %38, %48 : vector<16x16xf32>
    %cst_30 = arith.constant 1.000000e+00 : f32
    %50 = vector.broadcast %cst_30 : f32 to vector<16x16xf32>
    %51 = arith.subf %50, %49 : vector<16x16xf32>
    %cst_31 = arith.constant 5.000000e-01 : f32
    %52 = vector.broadcast %cst_31 : f32 to vector<16x16xf32>
    %53 = arith.mulf %51, %52 : vector<16x16xf32>
    %54 = arith.subf %8, %9 : vector<16x16xf32>
    %55 = math.absf %54 : vector<16x16xf32>
    %cst_32 = arith.constant 8.500000e-01 : f32
    %56 = vector.broadcast %cst_32 : f32 to vector<16x16xf32>
    %57 = arith.mulf %53, %56 : vector<16x16xf32>
    %cst_33 = arith.constant 1.500000e-01 : f32
    %58 = vector.broadcast %cst_33 : f32 to vector<16x16xf32>
    %59 = arith.mulf %55, %58 : vector<16x16xf32>
    %60 = arith.addf %57, %59 : vector<16x16xf32>
    %61 = arith.mulf %60, %5 : vector<16x16xf32>
    %62 = vector.shape_cast %61 : vector<16x16xf32> to vector<1x16x16xf32>
    %cst_34 = arith.constant dense<0.000000e+00> : vector<1xf32>
    %63 = vector.multi_reduction <add>, %62, %cst_34 [1, 2] : vector<1x16x16xf32> to vector<1xf32>
    %64 = vector.shape_cast %63 : vector<1xf32> to vector<1x1x1xf32>
    %65 = vector.extract %64[0, 0, 0] : f32 from vector<1x1x1xf32>
    %66 = tpu.iota {dimensions = array<i32: 1>} : vector<1x2x128xi32>
    %c0_i32 = arith.constant 0 : i32
    %67 = vector.broadcast %c0_i32 : i32 to vector<1x2x128xi32>
    %68 = arith.cmpi eq, %66, %67 : vector<1x2x128xi32>
    %c0_i32_35 = arith.constant 0 : i32
    %69 = arith.cmpi eq, %arg1, %c0_i32_35 : i32
    %70 = arith.extui %69 : i1 to i32
    %c0_i32_36 = arith.constant 0 : i32
    %71 = arith.cmpi ne, %70, %c0_i32_36 : i32
    scf.if %71 {
      %78 = vector.shape_cast %5 : vector<16x16xf32> to vector<1x16x16xf32>
      %cst_44 = arith.constant dense<0.000000e+00> : vector<1xf32>
      %79 = vector.multi_reduction <add>, %78, %cst_44 [1, 2] : vector<1x16x16xf32> to vector<1xf32>
      %80 = vector.shape_cast %79 : vector<1xf32> to vector<1x1x1xf32>
      %81 = vector.extract %80[0, 0, 0] : f32 from vector<1x1x1xf32>
      %cst_45 = arith.constant 0.000000e+00 : f32
      %82 = vector.broadcast %cst_45 : f32 to vector<1x2x128xf32>
      %83 = vector.broadcast %81 : f32 to vector<1x2x128xf32>
      %84 = arith.select %68, %82, %83 : vector<1x2x128xi1>, vector<1x2x128xf32>
      %c0_46 = arith.constant 0 : index
      %c0_47 = arith.constant 0 : index
      %c0_48 = arith.constant 0 : index
      %85 = vector.load %arg7[%c0_46, %c0_47, %c0_48] : memref<1x2x128xf32, #tpu.memory_space<vmem>>, vector<1x2x128xf32>
      tpu.vector_store %arg7[%c0_46, %c0_47, %c0_48], %84 {strides = array<i32>} : memref<1x2x128xf32, #tpu.memory_space<vmem>>, vector<1x2x128xf32>,
    } else {
    }
    %c0_37 = arith.constant 0 : index
    %c0_38 = arith.constant 0 : index
    %c0_39 = arith.constant 0 : index
    %72 = vector.load %arg7[%c0_37, %c0_38, %c0_39] : memref<1x2x128xf32, #tpu.memory_space<vmem>>, vector<1x2x128xf32>
    %cst_40 = arith.constant 0.000000e+00 : f32
    %73 = vector.broadcast %65 : f32 to vector<1x2x128xf32>
    %74 = vector.broadcast %cst_40 : f32 to vector<1x2x128xf32>
    %75 = arith.select %68, %73, %74 : vector<1x2x128xi1>, vector<1x2x128xf32>
    %76 = arith.addf %72, %75 : vector<1x2x128xf32>
    %c0_41 = arith.constant 0 : index
    %c0_42 = arith.constant 0 : index
    %c0_43 = arith.constant 0 : index
    %77 = vector.load %arg7[%c0_41, %c0_42, %c0_43] : memref<1x2x128xf32, #tpu.memory_space<vmem>>, vector<1x2x128xf32>
    tpu.vector_store %arg7[%c0_41, %c0_42, %c0_43], %76 {strides = array<i32>} : memref<1x2x128xf32, #tpu.memory_space<vmem>>, vector<1x2x128xf32>,
    return
  }
  func.func @transform_0(%arg0: i32, %arg1: i32) -> (i32, i32) {
    %c0_i32 = arith.constant 0 : i32
    %c0_i32_0 = arith.constant 0 : i32
    %c0_i32_1 = arith.constant 0 : i32
    return %c0_i32, %c0_i32_0 : i32, i32
  }
  func.func @transform_1(%arg0: i32, %arg1: i32) -> (i32, i32) {
    %c0_i32 = arith.constant 0 : i32
    %c0_i32_0 = arith.constant 0 : i32
    %c0_i32_1 = arith.constant 0 : i32
    return %c0_i32, %c0_i32_0 : i32, i32
  }
  func.func @transform_2(%arg0: i32, %arg1: i32) -> (i32, i32, i32, i32) {
    %c0_i32 = arith.constant 0 : i32
    %c0_i32_0 = arith.constant 0 : i32
    %c0_i32_1 = arith.constant 0 : i32
    return %arg0, %arg1, %c0_i32, %c0_i32_0 : i32, i32, i32, i32
  }
  func.func @transform_3(%arg0: i32, %arg1: i32) -> (i32, i32, i32, i32) {
    %c0_i32 = arith.constant 0 : i32
    %c0_i32_0 = arith.constant 0 : i32
    %c0_i32_1 = arith.constant 0 : i32
    return %arg0, %arg1, %c0_i32, %c0_i32_0 : i32, i32, i32, i32
  }
  func.func @transform_4(%arg0: i32, %arg1: i32) -> (i32, i32, i32, i32) {
    %c0_i32 = arith.constant 0 : i32
    %c0_i32_0 = arith.constant 0 : i32
    %c0_i32_1 = arith.constant 0 : i32
    %c0_i32_2 = arith.constant 0 : i32
    return %arg0, %c0_i32, %c0_i32_0, %c0_i32_1 : i32, i32, i32, i32
  }
  func.func @transform_5(%arg0: i32, %arg1: i32) -> (i32, i32, i32) {
    %c0_i32 = arith.constant 0 : i32
    %c0_i32_0 = arith.constant 0 : i32
    %c0_i32_1 = arith.constant 0 : i32
    return %arg0, %c0_i32, %c0_i32_0 : i32, i32, i32
  }
}

</mosaic_0001>

<bundles_post_ra>
// kernel: tpu_custom_call.1
= control target key start
LH: loop header
LB: loop body
LE: loop exit
PB: predicated region body
PF: predicated region fallthrough
CT: control target
= control target key end

     0   :  { %s1807_s0 = inlined_call_operand.hbm [shape: f32[16,16], index: 0, kind: input, shape index: {}]   ;;  %s1808_s1 = inlined_call_operand.hbm [shape: f32[16,16], index: 1, kind: input, shape index: {}]   ;;  %s1809_s2 = inlined_call_operand.hbm [shape: f32[2,3,16,16], index: 2, kind: input, shape index: {}]   ;;  %s1810_s3 = inlined_call_operand.hbm [shape: f32[2,3,16,16], index: 3, kind: input, shape index: {}]   ;;  %s1811_s4 = inlined_call_operand.hbm [shape: f32[2,1,16,16], index: 4, kind: input, shape index: {}]   ;;  %s1812_s5 = inlined_call_operand.hbm [shape: f32[2,2,128], index: 5, kind: output, shape index: {}]  }
   0x1   :  { %1827 = sst [smem:[#allocation25_spill]] %s1807_s0 }
   0x2   :  { %1828 = sst [smem:[#allocation26_spill]] %s1812_s5 }
   0x3   :  { %10 = vsyncpa [#allocation3], 0 }
   0x4   :  { %11 = vsyncpa [#allocation6], 0 }
   0x5   :  { %12 = vsyncpa [#allocation4], 0 }
   0x6   :  { %14 = vsyncpa [#allocation4 + $0x1], 0  ;;  %s1459_s18 = smov 0   ;;  %s1461_s19 = smov 0  }
   0x7   :  { %s1463_s20 = smov 0   ;;  %s1465_s21 = smov 0  }
   0x8   :  { %s1467_s22 = smov 0   ;;  %s1469_s23 = smov 0  }
   0x9   :  { %s1471_s24 = smov 0   ;;  %s1473_s25 = smov 0  }
   0xa   :  { %s1475_s26 = smov 0   ;;  %s1477_s27 = smov 0  }
   0xb   :  { %s1479_s28 = smov 0  }
   0xc LB: > { %1829 = sst [smem:[#allocation16_spill]] %s1383_s18  ;;  %s1513_s29 = sadd.s32 4294967295, %s1423_s28   ;;  %s1423_s28 = sphi %s1479_s28, %s20_s28   ;;  %s1419_s27 = sphi %s1477_s27, %s1868_s27   ;;  %s1415_s26 = sphi %s1475_s26, %s1867_s26   ;;  %s1411_s25 = sphi %s1473_s25, %s1866_s25   ;;  %s1407_s24 = sphi %s1471_s24, %s1865_s24   ;;  %s1403_s23 = sphi %s1469_s23, %s1864_s23   ;;  %s1399_s22 = sphi %s1467_s22, %s1863_s22   ;;  %s1395_s21 = sphi %s1465_s21, %s1856_s21   ;;  %s1391_s20 = sphi %s1463_s20, %s1862_s20   ;;  %s1387_s19 = sphi %s1461_s19, %s1861_s19   ;;  %s1383_s18 = sphi %s1459_s18, %s1860_s18  }
   0xd   : > { %1830 = sst [smem:[#allocation17_spill]] %s1399_s22  ;;  %s943_s30 = sadd.s32 4294967294, %s1423_s28  }
   0xe   : > { %1831 = sst [smem:[#allocation18_spill]] %s1407_s24  ;;  %p96_p0 = scmp.ne.s32.totalorder %s1399_s22, %s1395_s21 }
   0xf   : > { %1832 = sst [smem:[#allocation19_spill]] %s1411_s25  ;;  %p97_p1 = scmp.eq.s32.totalorder %s1513_s29, 0 }
  0x10   : > { %p150_p2 = scmp.ne.s32.totalorder %s1387_s19, %s1383_s18  ;;  %p174_p3 = scmp.eq.s32.totalorder %s1513_s29, 5 }
  0x11   : > { %p1523_p4 = por %p97_p1, %p96_p0  ;;  %p180_p5 = scmp.eq.s32.totalorder %s943_s30, 5 }
  0x12   : > { %p1529_p6 = por %p150_p2, %p97_p1  ;;  %p944_p7 = scmp.ge.s32.totalorder %s1423_s28, 1 }
  0x13   : > { %s1833_s6 = scalar_select %p1523_p4, 1, 0 }
  0x14   : > { %s1835_s7 = scalar_select %p1529_p6, 1, 0 }
  0x15   : > { %1834 = sst [smem:[#allocation20_spill]] %s1833_s6  ;;  %p1534_p8 = por %p180_p5, %p150_p2 }
  0x16   : > { %1836 = sst [smem:[#allocation21_spill]] %s1835_s7  ;;  %p187_p9 = scmp.lt.s32.totalorder %s1423_s28, 7 }
  0x17   : > { %s1837_s8 = scalar_select %p1534_p8, 1, 0 }
  0x18   : > { %s1839_s0 = sld [smem:[#allocation25_spill]]  ;;  %p1542_p10 = pnand %p944_p7, %p187_p9 }
  0x19   : > { %1838 = sst [smem:[#allocation22_spill]] %s1837_s8  ;;  %s1425_s13 = smov [#allocation2]  }
  0x1a   : > { %p1016_p11 = pneg %p1542_p10  ;;  %s200_s14 = sshll.u32 %s1425_s13, 4  ;;  %s201_s14 = int_to_ptr.vmem [resolvable:$true] %s200_s14 }
  0x1b   : > { %s1813_s16 = smov 128   ;;  %s1815_s17 = smov 8  }
  0x1c   : > { %p1550_p12 = pnand %p1016_p11, %p97_p1  ;;  %s29_s21 = sadd.s32 1, %s1415_s26 }
  0x1d   : > { %p30_p13 = scmp.ge.s32.totalorder %s29_s21, 3  ;;  %s32_s30 = sadd.s32 1, %s1419_s27 }
  0x1e   : > { %s198_s11 = sshll.u32 %s1839_s0, 4  ;;  %s83_s9 = sadd.s32 1, %s1403_s23  ;;  %s199_s11 = int_to_ptr.hbm [resolvable:$true] %s198_s11 }
  0x1f   : > { %1019 = dma.hbm_to_vmem [thread:$0]  (!%p1550_p12), %s199_s11, 256, %s201_s14, [#allocation3], %s1813_s16, %s1813_s16, %s1815_s17  }
  0x20   : > { %p90_p0 = scmp.ne.s32.totalorder %s1403_s23, %s1399_s22  ;;  %s1870_s21 = smov (%p30_p13, %s29_s21), 0 }
  0x21   : > { %1842 = sst [smem:[#allocation23_spill]] %s1870_s21  ;;  %s1872_s30 = smov (!%p30_p13, %s32_s30), %s1419_s27 }
  0x22   : > { %s79_s10 = ssub.s32 %s1415_s26, %s1870_s21  ;;  %p91_p2 = scmp.eq.s32.totalorder %s1423_s28, 0 }
  0x23   : > { %p34_p5 = scmp.ge.s32.totalorder %s1872_s30, 2  ;;  %p1039_p7 = scmp.lt.s32.totalorder %s1423_s28, 6 }
  0x24   : > { %p1573_p9 = por %p91_p2, %p90_p0  ;;  %s228_s13 = sand.u32 1, %s1423_s28  }
  0x25   : > { %s1874_s30 = smov (%p34_p5, %s1872_s30), 0  ;;  %s230_s14 = sand.u32 1, %s1403_s23  }
  0x26   : > { %1844 = sst [smem:[#allocation24_spill]] %s1874_s30  ;;  %s1583_s16 = ssub.s32 %s1419_s27, %s1874_s30 }
  0x27   : > { %s948_s17 = sshll.u32 %s230_s14, 4  ;;  %s80_s0 = sor.u32 %s79_s10, %s1583_s16 }
  0x28   : > { %p135_p11 = scmp.eq.s32.totalorder %s1583_s16, 0  ;;  %p81_p13 = scmp.eq.s32.totalorder %s80_s0, 0 }
  0x29   : > { %s949_s21 = sshll.u32 %s1415_s26, 1  ;;  %s994_s8 = smul.u32 6, %s1419_s27 }
  0x2a   : > { %s1590_s18 = scalar_select %p81_p13, %s1403_s23, %s83_s9  }
  0x2b   : > { %s237_s5 = sadd.s32 %s994_s8, %s949_s21  ;;  %s232_s25 = scalar_lea.vmem [#allocation7], %s948_s17 }
  0x2c   : > { %s242_s24 = sshll.u32 %s232_s25, 4  ;;  %s950_s7 = sshll.u32 %s237_s5, 3  ;;  %s243_s24 = int_to_ptr.vmem [resolvable:$true] %s242_s24 }
  0x2d   : > { %s239_s30 = scalar_lea.hbm %s1809_s2, %s950_s7  ;;  %p1024_p0 = pnand %p1039_p7, %p1573_p9 }
  0x2e   : > { %s240_s14 = sshll.u32 %s239_s30, 4  ;;  %s1599_s0 = scalar_lea.sflag [#allocation3], %s228_s13  ;;  %s241_s14 = int_to_ptr.hbm [resolvable:$true] %s240_s14 }
  0x2f   : > { %s1845_s9 = smov 8   ;;  %s1846_s10 = smov 128  }
  0x30   : > { %1026 = dma.hbm_to_vmem [thread:$0]  (!%p1024_p0), %s241_s14, 256, %s243_s24, %s1599_s0, %s1846_s10, %s1846_s10, %s1845_s9  }
  0x31   : > { %s263_s25 = scalar_lea.hbm %s1810_s3, %s950_s7  ;;  %s256_s6 = scalar_lea.vmem [#allocation8], %s948_s17 }
  0x32   : > { %s266_s8 = sshll.u32 %s256_s6, 4  ;;  %s264_s21 = sshll.u32 %s263_s25, 4  ;;  %s267_s8 = int_to_ptr.vmem [resolvable:$true] %s266_s8  ;;  %s265_s21 = int_to_ptr.hbm [resolvable:$true] %s264_s21 }
  0x33   : > { %s212_s13 = sshll.u32 %s1808_s1, 4  ;;  %s1428_s24 = smov [#allocation5]   ;;  %s213_s13 = int_to_ptr.hbm [resolvable:$true] %s212_s13 }
  0x34   : > { %1029 = dma.hbm_to_vmem [thread:$0]  (!%p1024_p0), %s265_s21, 256, %s267_s8, %s1599_s0, %s1846_s10, %s1846_s10, %s1845_s9  }
  0x35   : > { %s214_s7 = sshll.u32 %s1428_s24, 4  ;;  %s137_s17 = sadd.s32 1, %s1391_s20  ;;  %s215_s7 = int_to_ptr.vmem [resolvable:$true] %s214_s7 }
  0x36   : > { %1022 = dma.hbm_to_vmem [thread:$0]  (!%p1550_p12), %s213_s13, 256, %s215_s7, [#allocation6], %s1846_s10, %s1846_s10, %s1845_s9  }
  0x37   : > { %p144_p5 = scmp.ne.s32.totalorder %s1391_s20, %s1387_s19  ;;  %s278_s22 = sand.u32 1, %s1391_s20  }
  0x38   : > { %s1626_s14 = scalar_select %p135_p11, %s1391_s20, %s137_s17  }
  0x39   : > { %p146_p9 = por %p144_p5, %p91_p2  ;;  %p1632_p13 = por %p174_p3, %p144_p5 }
  0x3a   : > { %s989_s15 = sshll.u32 %s1419_s27, 4  ;;  %s954_s25 = sshll.u32 %s278_s22, 4 }
  0x3b   : > { %s285_s21 = scalar_lea.hbm %s1811_s4, %s989_s15  ;;  %s280_s11 = scalar_lea.vmem [#allocation9], %s954_s25 }
  0x3c   : > { %s286_s30 = sshll.u32 %s285_s21, 4  ;;  %s288_s16 = sshll.u32 %s280_s11, 4  ;;  %s287_s30 = int_to_ptr.hbm [resolvable:$true] %s286_s30  ;;  %s289_s16 = int_to_ptr.vmem [resolvable:$true] %s288_s16 }
  0x3d   : > { %p1030_p12 = pnand %p1039_p7, %p146_p9  ;;  %300 = sbr.rel (%p1542_p10) target bundleno = 818 (0x332), region = 40 }
  0x3f   : > { %1032 = dma.hbm_to_vmem [thread:$0]  (!%p1030_p12), %s287_s30, 256, %s289_s16, %s1599_s0, %s1846_s10, %s1846_s10, %s1845_s9  }
  0x42   : > { %1362 = dma.done.wait (%p97_p1), [#allocation3], 256  }
  0x43   : > { %1364 = vsyncadd (%p97_p1), [#allocation3], 4294967040 }
  0x44   : > { %1366 = dma.done.wait (%p97_p1), [#allocation6], 256  }
  0x45   : > { %1368 = vsyncadd (%p97_p1), [#allocation6], 4294967040  ;;  %s1848_s13 = sld [smem:[#allocation17_spill]]  ;;  %s312_s7 = sand.u32 1, %s1513_s29  }
  0x46   : > { %s313_s12 = scalar_lea.sflag [#allocation3], %s312_s7 }
  0x4b   : > { %s314_s0 = sand.u32 1, %s1848_s13  }
  0x4c   : > { %s1659_s9 = sshll.u32 %s314_s0, 4 }
  0x4d   : > { %s316_s10 = scalar_lea.vmem [#allocation7], %s1659_s9 }
  0x4e   : > { %1370 = dma.done.wait (%p1523_p4), %s313_s12, 512  }
  0x4f   : > { %1372 = vsyncadd (%p1523_p4), %s313_s12, 4294966784  ;;  %s1667_s22 = sand.u32 1, %s1387_s19   ;;  %s326_s25 = scalar_lea.vmem [#allocation8], %s1659_s9 }
  0x50   : > { %s962_s15 = sshll.u32 %s1667_s22, 4 }
  0x51   : > { %s336_s29 = scalar_lea.vmem [#allocation9], %s962_s15 }
  0x52   : > { %1374 = dma.done.wait (%p1529_p6), %s313_s12, 256  }
  0x53   : > { %1376 = vsyncadd (%p1529_p6), %s313_s12, 4294967040  ;;  %s963_s6 = sshll.u32 %s1667_s22, 1  ;;  %v383_v0 = vld [vmem:[#allocation5 + $0x8] sm:$0xff]  ;;  %v382_v1 = vld [vmem:[#allocation5] sm:$0xff]  ;;  %vm388_vm0 = vcmask 130048   ;;  %s1851_s30 = sld [smem:[#allocation18_spill]] }
  0x54   : > { %v374_v2 = vld [vmem:[%s316_s10] sm:$0xff]  ;;  %409 = vmatpush.msra.mxu0 %v383_v0  ;;  %990 = vmatpush.msra.mxu2 %v383_v0  ;;  %v375_v4 = vld [vmem:[%s316_s10 + $0x8] sm:$0xff]  ;;  %s1742_s21 = scalar_lea.vmem [#allocation10], %s963_s6 }
  0x55   : > { %v1676_v3 = vld [vmem:[%s336_s29] sm:$0xff]  ;;  %v1678_v5 = vld [vmem:[%s336_s29 + $0x8] sm:$0xff] }
  0x56   : > { %v1681_v6 = vmul.f32 %v1676_v3, %v374_v2  ;;  %v1684_v7 = vmul.f32 %v1678_v5, %v375_v4  ;;  %410 = vmatpush.msra.mxu0 %v382_v1  ;;  %991 = vmatpush.msra.mxu2 %v382_v1  ;;  %v376_v8 = vld [vmem:[%s326_s25] sm:$0xff]  ;;  %v377_v11 = vld [vmem:[%s326_s25 + $0x8] sm:$0xff] }
  0x57   : > { %v1693_v9 = vmul.f32 %v1676_v3, %v376_v8  ;;  %v1703_v12 = vmul.f32 %v1678_v5, %v377_v11  ;;  %v380_v20 = vld [vmem:[#allocation2] sm:$0xff]  ;;  %v381_v21 = vld [vmem:[#allocation2 + $0x8] sm:$0xff] }
  0x58   : > { %964 = vmatmul.msk.f32.vlgmr.msra.gmra.mxu0 %vm388_vm0, %v1681_v6  ;;  %965 = vmatmul.msk.f32.vlgmr.msra.gmra.mxu2 %vm388_vm0, %v1684_v7  ;;  %v499_v10 = vmul.f32 %v1681_v6, %v1681_v6  ;;  %v500_v13 = vmul.f32 %v1684_v7, %v1684_v7 }
  0x59   : > { %467 = vmatpush.msrb.mxu2 %v383_v0  ;;  %521 = vmatpush.msrb.mxu0 %v383_v0  ;;  %v557_v14 = vmul.f32 %v1693_v9, %v1693_v9  ;;  %v615_v15 = vmul.f32 %v1693_v9, %v1681_v6  ;;  %v558_v16 = vmul.f32 %v1703_v12, %v1703_v12  ;;  %p984_p1 = scmp.ne.s32.totalorder %s1851_s30, 0 }
  0x5a   : > { %v616_v17 = vmul.f32 %v1703_v12, %v1684_v7 }
  0x5b   : > { %468 = vmatpush.msrb.mxu2 %v382_v1  ;;  %522 = vmatpush.msrb.mxu0 %v382_v1 }
  0x5d   : > { %579 = vmatpush.msra.mxu2 %v383_v0  ;;  %637 = vmatpush.msra.mxu0 %v383_v0 }
  0x5f   : > { %580 = vmatpush.msra.mxu2 %v382_v1  ;;  %638 = vmatpush.msra.mxu0 %v382_v1 }
  0x60   : > { %968 = vmatmul.msk.f32.vlgmr.msrb.gmra.mxu2 %vm388_vm0, %v1693_v9  ;;  %972 = vmatmul.msk.f32.vlgmr.msrb.gmra.mxu0 %vm388_vm0, %v499_v10 }
  0x68   : > { %969 = vmatmul.msk.f32.gmra.mxu2 %vm388_vm0, %v1703_v12  ;;  %973 = vmatmul.msk.f32.gmra.mxu0 %vm388_vm0, %v500_v13 }
  0x70   : > { %976 = vmatmul.msk.f32.vlgmr.msra.gmra.mxu2 %vm388_vm0, %v557_v14  ;;  %980 = vmatmul.msk.f32.vlgmr.msra.gmra.mxu0 %vm388_vm0, %v615_v15 }
  0x78   : > { %977 = vmatmul.msk.f32.gmra.mxu2 %vm388_vm0, %v558_v16  ;;  %981 = vmatmul.msk.f32.gmra.mxu0 %vm388_vm0, %v616_v17 }
  0xd5   : > { %v412_v18 = vpop.f32.mrf.mxu0 }
  0xdb   : > { %v415_v19 = vpop.f32.mrf.mxu2 }
  0xdc   : > { %438 = vmatpush.msra.mxu1 %v415_v19  ;;  %992 = vmatpush.msra.mxu3 %v415_v19 }
  0xdd   : > { %v524_v22 = vpop.f32.mrf.mxu0 }
  0xde   : > { %439 = vmatpush.msra.mxu1 %v412_v18  ;;  %993 = vmatpush.msra.mxu3 %v412_v18 }
  0xdf   : > { %966 = vmatmul.msk.f32.vlgmr.msra.gmra.mxu1 %vm388_vm0, %v380_v20  ;;  %967 = vmatmul.msk.f32.vlgmr.msra.gmra.mxu3 %vm388_vm0, %v381_v21 }
  0xe3   : > { %v470_v23 = vpop.f32.mrf.mxu2 }
  0xe5   : > { %v527_v24 = vpop.f32.mrf.mxu0 }
  0xe6   : > { %544 = vmatpush.msrb.mxu1 %v527_v24 }
  0xe8   : > { %545 = vmatpush.msrb.mxu1 %v524_v22 }
  0xe9   : > { %974 = vmatmul.msk.f32.vlgmr.msrb.gmra.mxu1 %vm388_vm0, %v380_v20 }
  0xeb   : > { %v473_v25 = vpop.f32.mrf.mxu2 }
  0xec   : > { %490 = vmatpush.msrb.mxu3 %v473_v25  ;;  %v729_v25 = vsub.f32 %v1681_v6, %v1693_v9 }
  0xed   : > { %v640_v26 = vpop.f32.mrf.mxu0 }
  0xee   : > { %491 = vmatpush.msrb.mxu3 %v470_v23 }
  0xef   : > { %970 = vmatmul.msk.f32.vlgmr.msrb.gmra.mxu3 %vm388_vm0, %v380_v20 }
  0xf1   : > { %975 = vmatmul.msk.f32.gmra.mxu1 %vm388_vm0, %v381_v21 }
  0xf3   : > { %v582_v27 = vpop.f32.mrf.mxu2 }
  0xf5   : > { %v643_v28 = vpop.f32.mrf.mxu0 }
  0xf6   : > { %660 = vmatpush.msra.mxu1 %v643_v28 }
  0xf7   : > { %971 = vmatmul.msk.f32.gmra.mxu3 %vm388_vm0, %v381_v21 }
  0xf8   : > { %661 = vmatpush.msra.mxu1 %v640_v26 }
  0xf9   : > { %982 = vmatmul.msk.f32.vlgmr.msra.gmra.mxu1 %vm388_vm0, %v380_v20 }
  0xfb   : > { %v585_v29 = vpop.f32.mrf.mxu2 }
  0xfc   : > { %602 = vmatpush.msra.mxu3 %v585_v29 }
  0xfe   : > { %603 = vmatpush.msra.mxu3 %v582_v27 }
  0xff   : > { %978 = vmatmul.msk.f32.vlgmr.msra.gmra.mxu3 %vm388_vm0, %v380_v20 }
 0x101   : > { %983 = vmatmul.msk.f32.gmra.mxu1 %vm388_vm0, %v381_v21 }
 0x107   : > { %979 = vmatmul.msk.f32.gmra.mxu3 %vm388_vm0, %v381_v21 }
 0x15c   : > { %v441_v31 = vpop.f32.mrf.mxu1 }
 0x15d   : > { %v553_v36 = vmul.f32 %v441_v31, %v441_v31  ;;  %v673_v58 = vmul.f32 2.0, %v441_v31 }
 0x162   : > { %v444_v30 = vpop.f32.mrf.mxu3 }
 0x163   : > { %v554_v47 = vmul.f32 %v444_v30, %v444_v30  ;;  %v674_v17 = vmul.f32 2.0, %v444_v30 }
 0x166   : > { %v547_v33 = vpop.f32.mrf.mxu1 }
 0x167   : > { %v555_v39 = vsub.f32 %v547_v33, %v553_v36 }
 0x16e   : > { %v550_v35 = vpop.f32.mrf.mxu1 }
 0x16f   : > { %v556_v50 = vsub.f32 %v550_v35, %v554_v47  ;;  %v731_v35 = vand.u32 2147483647, %v729_v25 }
 0x172   : > { %v493_v32 = vpop.f32.mrf.mxu3 }
 0x173   : > { %v611_v37 = vmul.f32 %v493_v32, %v493_v32  ;;  %v669_v53 = vmul.f32 %v493_v32, %v441_v31  ;;  %v675_v1 = vmul.f32 %v673_v58, %v493_v32 }
 0x175   : > { %v685_v41 = vadd.f32 %v611_v37, %v553_v36  ;;  %v677_v14 = vadd.f32 0.0001, %v675_v1 }
 0x176   : > { %v663_v46 = vpop.f32.mrf.mxu1 }
 0x177   : > { %v687_v43 = vadd.f32 0.0001, %v685_v41  ;;  %v671_v55 = vsub.f32 %v663_v46, %v669_v53 }
 0x179   : > { %v679_v61 = vmul.f32 2.0, %v671_v55 }
 0x17a   : > { %v496_v34 = vpop.f32.mrf.mxu3 }
 0x17b   : > { %v612_v45 = vmul.f32 %v496_v34, %v496_v34  ;;  %v670_v0 = vmul.f32 %v496_v34, %v444_v30  ;;  %v681_v10 = vadd.f32 0.0009, %v679_v61  ;;  %v676_v23 = vmul.f32 %v674_v17, %v496_v34 }
 0x17c   : > { %v730_v34 = vsub.f32 %v1684_v7, %v1703_v12 }
 0x17d   : > { %v686_v52 = vadd.f32 %v612_v45, %v554_v47  ;;  %v683_v20 = vmul.f32 %v681_v10, %v677_v14  ;;  %v678_v33 = vadd.f32 0.0001, %v676_v23 }
 0x17e   : > { %v666_v62 = vpop.f32.mrf.mxu1  ;;  %v732_v41 = vand.u32 2147483647, %v730_v34 }
 0x17f   : > { %v688_v56 = vadd.f32 0.0001, %v686_v52  ;;  %v672_v4 = vsub.f32 %v666_v62, %v670_v0 }
 0x180   : > { %v736_v46 = vmul.f32 0.15, %v732_v41 }
 0x181   : > { %v680_v18 = vmul.f32 2.0, %v672_v4 }
 0x182   : > { %v605_v38 = vpop.f32.mrf.mxu3 }
 0x183   : > { %v613_v40 = vsub.f32 %v605_v38, %v611_v37  ;;  %v682_v28 = vadd.f32 0.0009, %v680_v18 }
 0x185   : > { %v689_v42 = vadd.f32 %v613_v40, %v555_v39  ;;  %v684_v39 = vmul.f32 %v682_v28, %v678_v33 }
 0x187   : > { %v691_v44 = vadd.f32 0.0009, %v689_v42 }
 0x189   : > { %v693_v48 = vmul.f32 %v691_v44, %v687_v43  ;;  %v735_v43 = vmul.f32 0.15, %v731_v35 }
 0x18a   : > { %v608_v49 = vpop.f32.mrf.mxu3 }
 0x18b   : > { %1135 = vrcp.f32 %v693_v48  ;;  %v614_v51 = vsub.f32 %v608_v49, %v612_v45  ;;  %v706_v8 = vand.u32 2147483648, %v693_v48  ;;  %v704_v13 = vand.u32 2147483647, %v693_v48 }
 0x18c   : > { %vm700_vm2 = vweird.f32 %v693_v48 }
 0x18d   : > { %v690_v54 = vadd.f32 %v614_v51, %v556_v50  ;;  %v707_v19 = vor.u32 1.1754944e-38, %v706_v8  ;;  %vm705_vm4 = vcmp.eq.f32.partialorder %v704_v13, 8.507059e+37 }
 0x18f   : > { %v692_v57 = vadd.f32 0.0009, %v690_v54 }
 0x191   : > { %v1136_v59 = vpop.eup %1135  ;;  %v694_v60 = vmul.f32 %v692_v57, %v688_v56 }
 0x192   : > { %v696_v63 = vmul.f32 %v1136_v59, %v693_v48  ;;  %vm701_vm1 = vweird.f32 %v1136_v59 }
 0x193   : > { %1137 = vrcp.f32 %v694_v60  ;;  %vm702_vm3 = vmor %vm700_vm2, %vm701_vm1  ;;  %v720_v29 = vand.u32 2147483648, %v694_v60  ;;  %v718_v32 = vand.u32 2147483647, %v694_v60  ;;  %vm714_vm6 = vweird.f32 %v694_v60 }
 0x194   : > { %v697_v2 = vsub.f32 1.0, %v696_v63 }
 0x195   : > { %v721_v38 = vor.u32 1.1754944e-38, %v720_v29  ;;  %vm719_vm8 = vcmp.eq.f32.partialorder %v718_v32, 8.507059e+37 }
 0x196   : > { %v698_v11 = vmul.f32 %v1136_v59, %v697_v2 }
 0x198   : > { %v699_v15 = vadd.f32 %v1136_v59, %v698_v11 }
 0x199   : > { %v1138_v16 = vpop.eup %1137 }
 0x19a   : > { %v710_v21 = vmul.f32 %v1138_v16, %v694_v60  ;;  %v703_v22 = vsel %vm702_vm3, %v1136_v59, %v699_v15  ;;  %vm715_vm5 = vweird.f32 %v1138_v16  ;;  %v753_v60 = vlaneseq }
 0x19b   : > { %v708_v24 = vsel %vm705_vm4, %v707_v19, %v703_v22  ;;  %vm716_vm7 = vmor %vm714_vm6, %vm715_vm5 }
 0x19c   : > { %v711_v26 = vsub.f32 1.0, %v710_v21  ;;  %v723_v27 = vmul.f32 %v708_v24, %v683_v20  ;;  %v754_v61 = vshrl.u32 %v753_v60, 7 }
 0x19e   : > { %v712_v31 = vmul.f32 %v1138_v16, %v711_v26  ;;  %v725_v30 = vsub.f32 1.0, %v723_v27  ;;  %vm755_vm9 = vcmp.eq.s32.totalorder %v754_v61, 0 }
 0x1a0   : > { %v713_v36 = vadd.f32 %v1138_v16, %v712_v31  ;;  %v727_v37 = vmul.f32 0.5, %v725_v30 }
 0x1a2   : > { %v717_v6 = vsel %vm716_vm7, %v1138_v16, %v713_v36  ;;  %v733_v42 = vmul.f32 0.85, %v727_v37 }
 0x1a3   : > { %v722_v9 = vsel %vm719_vm8, %v721_v38, %v717_v6 }
 0x1a4   : > { %v724_v40 = vmul.f32 %v722_v9, %v684_v39  ;;  %v737_v47 = vadd.f32 %v735_v43, %v733_v42 }
 0x1a6   : > { %v726_v44 = vsub.f32 1.0, %v724_v40  ;;  %v739_v50 = vmul.f32 %v737_v47, %v1676_v3 }
 0x1a8   : > { %v728_v45 = vmul.f32 0.5, %v726_v44  ;;  %v741_v12 = vsel %vm388_vm0, %v739_v50, 0.0 }
 0x1aa   : > { %v734_v48 = vmul.f32 0.85, %v728_v45 }
 0x1ac   : > { %v738_v49 = vadd.f32 %v736_v46, %v734_v48 }
 0x1ae   : > { %v740_v7 = vmul.f32 %v738_v49, %v1678_v5 }
 0x1b0   : > { %v742_v51 = vsel %vm388_vm0, %v740_v7, 0.0 }
 0x1b1   : > { %v743_v52 = vadd.f32 %v742_v51, %v741_v12 }
 0x1b3   : > { %744 = vadd.xlane.f32.xlu0 %v743_v52 }
 0x226   : > { %v745_v53 = vpop.xlane.xlu0 %744 }
 0x227   : > { %v746_v54 = vrot.slane %v745_v53, 4 }
 0x229   : > { %v747_v55 = vadd.f32 %v746_v54, %v745_v53 }
 0x22b   : > { %v748_v56 = vrot.slane %v747_v55, 2 }
 0x22d   : > { %v749_v57 = vadd.f32 %v748_v56, %v747_v55 }
 0x22f   : > { %v750_v58 = vrot.slane %v749_v57, 1 }
 0x231   : > { %v751_v59 = vadd.f32 %v750_v58, %v749_v57 }
 0x233   : > { %996 = vpush %v751_v59 }
 0x260   : > { %759 = sbr.rel (%p984_p1) target bundleno = 797 (0x31d), region = 64 }
 0x264   : > { %s997_s8 = spop %996 }
 0x265   : > { %v760_v62 = vsel %vm388_vm0, %v1676_v3, 0.0  ;;  %v761_v63 = vsel %vm388_vm0, %v1678_v5, 0.0 }
 0x266   : > { %v762_v0 = vadd.f32 %v761_v63, %v760_v62 }
 0x268   : > { %763 = vadd.xlane.f32.xlu0 %v762_v0 }
 0x2db   : > { %v764_v1 = vpop.xlane.xlu0 %763 }
 0x2dc   : > { %v765_v2 = vrot.slane %v764_v1, 4 }
 0x2de   : > { %v766_v4 = vadd.f32 %v765_v2, %v764_v1 }
 0x2e0   : > { %v767_v8 = vrot.slane %v766_v4, 2 }
 0x2e2   : > { %v768_v10 = vadd.f32 %v767_v8, %v766_v4 }
 0x2e4   : > { %v769_v11 = vrot.slane %v768_v10, 1 }
 0x2e6   : > { %v770_v13 = vadd.f32 %v769_v11, %v768_v10 }
 0x2e8   : > { %998 = vpush %v770_v13 }
 0x319   : > { %s999_s11 = spop %998 }
 0x31a   : > { %v772_v14 = vstv %s999_s11 }
 0x31b   : > { %v773_v15 = vsel %vm755_vm9, 0.0, %v772_v14 }
 0x31c   : > { %774 = vst [vmem:[%s1742_s21] sm:$0x3] %v773_v15 }
 0x31d PF: > { %s1852_s16 = sld [smem:[#allocation19_spill]]  ;;  %v776_v5 = vstv %s997_s8  ;;  %s793_s12 = sshll.u32 %s1742_s21, 4  ;;  %s794_s12 = int_to_ptr.vmem [resolvable:$true] %s793_s12 }
 0x31e   : > { %v777_v16 = vsel %vm755_vm9, %v776_v5, 0.0  ;;  %s1853_s0 = sld [smem:[#allocation26_spill]]  ;;  %s781_s17 = scalar_lea.sflag [#allocation4], %s1667_s22 }
 0x323   : > { %v775_v3 = vld [vmem:[%s1742_s21] sm:$0x3]  ;;  %s986_s13 = sshll.u32 %s1852_s16, 1 }
 0x324   : > { %s791_s9 = scalar_lea.hbm %s1853_s0, %s986_s13  ;;  %v778_v17 = vadd.f32 %v777_v16, %v775_v3  ;;  %s1309_s8 = scalar_lea.hbm %s1853_s0, 4 }
 0x325   : > { %s795_s10 = sshll.u32 %s791_s9, 4  ;;  %s796_s10 = int_to_ptr.hbm [resolvable:$true] %s795_s10 }
 0x326   : > { %779 = vst [vmem:[%s1742_s21] sm:$0x3] %v778_v17  ;;  %s1303_s15 = sshra.s32 %s796_s10, 4  ;;  %s1304_s15 = int_to_ptr.hbm [resolvable:$true] %s1303_s15 }
 0x327   : > { %s1305_s25 = scalar_lea.hbm %s1304_s15, 2  ;;  %p1310_p10 = scmp.lt.s32.totalorder %s1304_s15, %s1853_s0 }
 0x328   : > { %p1306_p3 = scmp.ne.s32.totalorder %s1304_s15, %s1305_s25  ;;  %p1311_p2 = scmp.lt.s32.totalorder %s1309_s8, %s1305_s25 }
 0x32a   : > { %p1307_p4 = pnand %p1306_p3, %p1632_p13  ;;  %p1312_p7 = por %p1311_p2, %p1310_p10 }
 0x32c   : > { %p1308_p6 = pneg %p1307_p4 }
 0x32e   : > { %p1313_p11 = pnand %p1312_p7, %p1308_p6 }
 0x330   : > { %1316 = shalt.err (!%p1313_p11)
}
 0x331   : > { %1014 = dma.vmem_to_hbm [thread:$0]  (%p1632_p13), %s794_s12, 32, %s796_s10, %s781_s17  }
 0x332 PF: > { %s1854_s22 = sld [smem:[#allocation16_spill]]  ;;  %p1042_p0 = scmp.ge.s32.totalorder %s1423_s28, 2 }
 0x334   : > { %p1034_p5 = pnand %p1042_p0, %p1534_p8 }
 0x336   : > { %p1035_p9 = pneg %p1034_p5 }
 0x338   : > { %s807_s16 = sand.u32 1, %s1854_s22  }
 0x339   : > { %s808_s13 = scalar_lea.sflag [#allocation4], %s807_s16 }
 0x33a   : > { %1378 = dma.done.wait (%p1035_p9), %s808_s13, 32  }
 0x33b   : > { %1380 = vsyncadd (%p1035_p9), %s808_s13, 4294967264  ;;  %s20_s28 = sadd.s32 1, %s1423_s28   ;;  %s1856_s21 = sld [smem:[#allocation17_spill]] }
 0x33c   : > { %p17_p12 = scmp.ge.s32.totalorder %s20_s28, 8   ;;  %s1857_s5 = smov %s1590_s18 }
 0x33d   : > { %s1858_s7 = sld [smem:[#allocation23_spill]]  ;;  %s1860_s18 = smov %s1387_s19 }
 0x33e   : > { %s1859_s9 = sld [smem:[#allocation24_spill]]  ;;  %s1861_s19 = smov %s1391_s20 }
 0x33f   : > { %s1862_s20 = smov %s1626_s14  ;;  %s1863_s22 = smov %s1403_s23 }
 0x340   : > { %s1864_s23 = smov %s1857_s5  ;;  %s1865_s24 = smov %s1415_s26 }
 0x341   : > { %s1866_s25 = smov %s1419_s27  ;;  %19 = sbr.rel (!%p17_p12) target bundleno = 12 (0xc), region = 118 }
 0x343   : > { %s1867_s26 = smov %s1858_s7 }
 0x344   : > { %s1868_s27 = smov %s1859_s9 }
 0x346   :  { %814 = vsyncpa [#allocation3], 1 }
 0x347   :  { %816 = vsyncpa [#allocation3 + $0x1], 1 }
 0x348   :  { %817 = vsyncpa [#allocation6], 1 }
 0x349   :  { %818 = vsyncpa [#allocation4], 1 }
 0x34a   :  { %820 = vsyncpa [#allocation4 + $0x1], 1 }

</bundles_post_ra>
